<compile_context>
chip_gen: v5e
topology: v5e:2x2
jax: 0.10.0
libtpu: 0.0.40
codegen_flags: <defaults>
</compile_context>

<pallas_src>
import functools

import jax
import jax.numpy as jnp
from jax import lax
from jax.experimental import pallas as pl
from jax.experimental.pallas import tpu as pltpu

STATE_DIM = 3      # Pendulum-v1 observation_space.shape[0]
HIDDEN = 256
INIT_W = 0.003


def _round_up(x, m):
    return ((x + m - 1) // m) * m


def _v_net_kernel(x_ref, w1_ref, b1_ref, w2_ref, b2_ref, w3_ref, b3_ref,
                  out_ref, *, state_dim):
    x = x_ref[...]                                   # (TB, S) f32 batch tile

    # --- layer 1: K = state_dim (3) is far too shallow for the systolic MXU;
    # do it as `state_dim` broadcast FMAs on the VPU (frees MXU for layer 2).
    h1 = b1_ref[...]                                 # (1, H), broadcasts up
    for d in range(state_dim):                       # static unroll (tiny)
        h1 = h1 + x[:, d:d + 1] * w1_ref[d:d + 1, :]
    h1 = jnp.maximum(h1, 0.0)                        # (TB, H) f32

    # --- layer 2: the only big matmul (256x256) -> MXU, f32 accumulation.
    # w2 arrives already in its matmul dtype (bf16 by default) from the
    # wrapper, so only the per-step activation cast happens here.
    h2 = jnp.dot(h1.astype(w2_ref.dtype), w2_ref[...],
                 preferred_element_type=jnp.float32) + b2_ref[...]
    h2 = jnp.maximum(h2, 0.0)                        # (TB, H) f32

    # --- layer 3: single output feature.  Contract w3 against h2's feature
    # axis with the batch landing on the LANE axis of the result (NT dimension
    # numbers, as in splash attention), producing a lane-dense (8, TB) slab
    # whose row 0 is the real answer -> unmasked stores, dense writeback DMA.
    prod = lax.dot_general(w3_ref[...], h2,
                           dimension_numbers=(((1,), (1,)), ((), ())),
                           preferred_element_type=jnp.float32)   # (8, TB)
    out_ref[0] = (prod[0:1, :] + b3_ref[...]).astype(out_ref.dtype)  # (1, TB)


def v_net_forward(x, params, *, block_b=4096, use_bf16_matmul=True):
    """Pallas forward. x: (B, state_dim) f32. Returns (B, 1) f32.

    block_b: max batch tile (multiple of 8).  4096 amortizes the per-grid-step
    overhead; the tile is additionally capped at ~half the (padded) batch so
    the grid always has >= 2 steps when the batch is splittable (v7x dual-TC).
    use_bf16_matmul: cast layer-2 matmul inputs to bf16 (f32 accumulate) for
    peak MXU rate on v5e/v6e/v7x.  Set False for exact-f32 PyTorch numerics.
    """
    w1, b1, w2, b2, w3, b3 = params
    B, S = x.shape
    H = w1.shape[1]
    assert w1.shape[0] == S

    # Batch tile: multiple of 8, capped at block_b, and chosen so the grid has
    # >= 2 steps whenever the (8-padded) batch can be split in two.
    b_pad8 = _round_up(B, 8)
    tb = min(_round_up(block_b, 8), _round_up((b_pad8 + 1) // 2, 8))
    b_pad = _round_up(B, tb)
    if b_pad != B:
        x = jnp.pad(x, ((0, b_pad - B), (0, 0)))
    n_tiles = b_pad // tb

    # Hoist the per-step weight cast: pre-cast the only matmul-rate-critical
    # operand once (also halves its resident VMEM and one-time DMA).
    w2_in = w2.astype(jnp.bfloat16) if use_bf16_matmul else w2
    # Zero-pad w3 from (1, H) to (8, H) so the layer-3 MXU lhs is sublane
    # aligned; the kernel only keeps result row 0.
    w3_pad = jnp.pad(w3, ((0, 8 - w3.shape[0]), (0, 0)))

    kernel = functools.partial(_v_net_kernel, state_dim=S)

    def resident(arr):
        # Weights/biases: same block every grid step -> DMA'd once, VMEM-resident.
        n = arr.ndim
        return pl.BlockSpec(arr.shape, lambda i, _n=n: (0,) * _n)

    flops = 2 * b_pad * (S * H + H * H + H)
    bytes_accessed = (4 * (b_pad * S + S * H + H + H + 8 * H + 1 + b_pad)
                      + w2_in.dtype.itemsize * H * H)

    out = pl.pallas_call(
        kernel,
        # Lane-dense output: one (1, tb) row-slab per grid step.
        out_shape=jax.ShapeDtypeStruct((n_tiles, 1, tb), jnp.float32),
        grid=(n_tiles,),
        in_specs=[
            pl.BlockSpec((tb, S), lambda i: (i, 0)),   # batch-tiled input
            resident(w1), resident(b1),
            resident(w2_in), resident(b2),
            resident(w3_pad), resident(b3),
        ],
        out_specs=pl.BlockSpec((1, 1, tb), lambda i: (i, 0, 0)),
        compiler_params=pltpu.CompilerParams(
            dimension_semantics=("parallel",),         # 2x on v7x dual-TC
            # > v5e's 16 MiB default scoped limit, < v7x's 64 MiB physical;
            # worst-case use at tb=4096 is ~25 MiB, so ample headroom.
            vmem_limit_bytes=48 * 1024 * 1024,
        ),
        cost_estimate=pl.CostEstimate(
            flops=flops, transcendentals=0, bytes_accessed=bytes_accessed),
    )(x, w1, b1, w2_in, b2, w3_pad, b3)

    return out.reshape(-1)[:B].reshape(B, 1)


def init_params(key, state_dim=STATE_DIM, hidden=HIDDEN, init_w=INIT_W):
    """Mirrors PyTorch nn.Linear defaults (uniform +/-1/sqrt(fan_in)) and the
    module's custom uniform(+/-init_w) on l3.  w1/w2 stored as (in, out) so
    the kernel computes x @ W directly; w3 kept in PyTorch's (1, 256) layout."""
    k1, k2, k3, k4, k5, k6 = jax.random.split(key, 6)
    lim1 = 1.0 / jnp.sqrt(jnp.float32(state_dim))
    lim2 = 1.0 / jnp.sqrt(jnp.float32(hidden))
    w1 = jax.random.uniform(k1, (state_dim, hidden), jnp.float32, -lim1, lim1)
    b1 = jax.random.uniform(k2, (1, hidden), jnp.float32, -lim1, lim1)
    w2 = jax.random.uniform(k3, (hidden, hidden), jnp.float32, -lim2, lim2)
    b2 = jax.random.uniform(k4, (1, hidden), jnp.float32, -lim2, lim2)
    w3 = jax.random.uniform(k5, (1, hidden), jnp.float32, -init_w, init_w)
    b3 = jax.random.uniform(k6, (1, 1), jnp.float32, -init_w, init_w)
    return (w1, b1, w2, b2, w3, b3)


def v_net_reference(x, params):
    w1, b1, w2, b2, w3, b3 = params
    h1 = jnp.maximum(x @ w1 + b1, 0.0)
    h2 = jnp.maximum(h1 @ w2 + b2, 0.0)
    return h2 @ w3.T + b3


if __name__ == "__main__":
    key = jax.random.PRNGKey(0)
    pkey, xkey1, xkey2 = jax.random.split(key, 3)

    params = init_params(pkey)

    # Small, tile-aligned batch — default (bf16 layer-2 matmul) path.
    x1 = jax.random.normal(xkey1, (8, STATE_DIM), dtype=jnp.float32)
    out1 = jax.block_until_ready(v_net_forward(x1, params))
    ref1 = v_net_reference(x1, params)
    assert out1.shape == (8, 1), out1.shape
    assert jnp.allclose(out1, ref1, atol=5e-2, rtol=5e-2), (out1, ref1)

    # Ragged batch (padded tail + multi-step grid) — exact f32 path.
    x2 = jax.random.normal(xkey2, (37, STATE_DIM), dtype=jnp.float32)
    out2 = jax.block_until_ready(
        v_net_forward(x2, params, use_bf16_matmul=False))
    ref2 = v_net_reference(x2, params)
    assert out2.shape == (37, 1), out2.shape
    assert jnp.allclose(out2, ref2, atol=1e-4, rtol=1e-4), (out2, ref2)

    print("KERNEL_OK")
</pallas_src>

<mosaic_0001>
module attributes {stable_mosaic.version = 11 : i64} {
  func.func @_v_net_kernel(%arg0: i32, %arg1: memref<8x3xf32, #tpu.memory_space<vmem>>, %arg2: memref<3x256xf32, #tpu.memory_space<vmem>>, %arg3: memref<1x256xf32, #tpu.memory_space<vmem>>, %arg4: memref<256x256xbf16, #tpu.memory_space<vmem>>, %arg5: memref<1x256xf32, #tpu.memory_space<vmem>>, %arg6: memref<8x256xf32, #tpu.memory_space<vmem>>, %arg7: memref<1x1xf32, #tpu.memory_space<vmem>>, %arg8: memref<1x1x8xf32, #tpu.memory_space<vmem>>) attributes {dimension_semantics = [#tpu.dimension_semantics<parallel>], iteration_bounds = array<i64: 1>, scalar_prefetch = 0 : i64, scratch_operands = 0 : i64, tpu.core_type = #tpu.core_type<tc>, window_params = [{transform_indices = @transform_0, window_bounds = array<i64: 8, 3>}, {pipeline_mode = #tpu.pipeline_mode<synchronous>, transform_indices = @transform_1, window_bounds = array<i64: 3, 256>}, {pipeline_mode = #tpu.pipeline_mode<synchronous>, transform_indices = @transform_2, window_bounds = array<i64: 1, 256>}, {pipeline_mode = #tpu.pipeline_mode<synchronous>, transform_indices = @transform_3, window_bounds = array<i64: 256, 256>}, {pipeline_mode = #tpu.pipeline_mode<synchronous>, transform_indices = @transform_4, window_bounds = array<i64: 1, 256>}, {pipeline_mode = #tpu.pipeline_mode<synchronous>, transform_indices = @transform_5, window_bounds = array<i64: 8, 256>}, {pipeline_mode = #tpu.pipeline_mode<synchronous>, transform_indices = @transform_6, window_bounds = array<i64: 1, 1>}, {transform_indices = @transform_7, window_bounds = array<i64: 1, 1, 8>}]} {
    %c0 = arith.constant 0 : index
    %c0_0 = arith.constant 0 : index
    %0 = vector.load %arg1[%c0, %c0_0] : memref<8x3xf32, #tpu.memory_space<vmem>>, vector<8x3xf32>
    %c0_1 = arith.constant 0 : index
    %c0_2 = arith.constant 0 : index
    %1 = vector.load %arg3[%c0_1, %c0_2] : memref<1x256xf32, #tpu.memory_space<vmem>>, vector<1x256xf32>
    %2 = vector.extract_strided_slice %0 {offsets = [0, 0], sizes = [8, 1], strides = [1, 1]} : vector<8x3xf32> to vector<8x1xf32>
    %c0_3 = arith.constant 0 : index
    %c0_4 = arith.constant 0 : index
    %3 = vector.load %arg2[%c0_3, %c0_4] : memref<3x256xf32, #tpu.memory_space<vmem>>, vector<1x256xf32>
    %4 = vector.broadcast %2 : vector<8x1xf32> to vector<8x256xf32>
    %5 = vector.broadcast %3 : vector<1x256xf32> to vector<8x256xf32>
    %6 = arith.mulf %4, %5 : vector<8x256xf32>
    %7 = vector.broadcast %1 : vector<1x256xf32> to vector<8x256xf32>
    %8 = arith.addf %7, %6 : vector<8x256xf32>
    %9 = vector.extract_strided_slice %0 {offsets = [0, 1], sizes = [8, 1], strides = [1, 1]} : vector<8x3xf32> to vector<8x1xf32>
    %c1 = arith.constant 1 : index
    %c0_5 = arith.constant 0 : index
    %10 = vector.load %arg2[%c1, %c0_5] : memref<3x256xf32, #tpu.memory_space<vmem>>, vector<1x256xf32>
    %11 = vector.broadcast %9 : vector<8x1xf32> to vector<8x256xf32>
    %12 = vector.broadcast %10 : vector<1x256xf32> to vector<8x256xf32>
    %13 = arith.mulf %11, %12 : vector<8x256xf32>
    %14 = arith.addf %8, %13 : vector<8x256xf32>
    %15 = vector.extract_strided_slice %0 {offsets = [0, 2], sizes = [8, 1], strides = [1, 1]} : vector<8x3xf32> to vector<8x1xf32>
    %c2 = arith.constant 2 : index
    %c0_6 = arith.constant 0 : index
    %16 = vector.load %arg2[%c2, %c0_6] : memref<3x256xf32, #tpu.memory_space<vmem>>, vector<1x256xf32>
    %17 = vector.broadcast %15 : vector<8x1xf32> to vector<8x256xf32>
    %18 = vector.broadcast %16 : vector<1x256xf32> to vector<8x256xf32>
    %19 = arith.mulf %17, %18 : vector<8x256xf32>
    %20 = arith.addf %14, %19 : vector<8x256xf32>
    %cst = arith.constant 0.000000e+00 : f32
    %21 = vector.broadcast %cst : f32 to vector<8x256xf32>
    %22 = arith.maximumf %20, %21 : vector<8x256xf32>
    %23 = arith.truncf %22 : vector<8x256xf32> to vector<8x256xbf16>
    %c0_7 = arith.constant 0 : index
    %c0_8 = arith.constant 0 : index
    %24 = vector.load %arg4[%c0_7, %c0_8] : memref<256x256xbf16, #tpu.memory_space<vmem>>, vector<256x256xbf16>
    %cst_9 = arith.constant dense<0.000000e+00> : vector<8x256xf32>
    %25 = tpu.matmul %23, %24, %cst_9 {dimension_numbers = #tpu.dot_dimension_numbers<[1], [0], [0], [1], [0, 0, 1, 1], [], []>} : vector<8x256xbf16>, vector<256x256xbf16>, vector<8x256xf32> -> vector<8x256xf32>
    %c0_10 = arith.constant 0 : index
    %c0_11 = arith.constant 0 : index
    %26 = vector.load %arg5[%c0_10, %c0_11] : memref<1x256xf32, #tpu.memory_space<vmem>>, vector<1x256xf32>
    %27 = vector.broadcast %26 : vector<1x256xf32> to vector<8x256xf32>
    %28 = arith.addf %25, %27 : vector<8x256xf32>
    %cst_12 = arith.constant 0.000000e+00 : f32
    %29 = vector.broadcast %cst_12 : f32 to vector<8x256xf32>
    %30 = arith.maximumf %28, %29 : vector<8x256xf32>
    %c0_13 = arith.constant 0 : index
    %c0_14 = arith.constant 0 : index
    %31 = vector.load %arg6[%c0_13, %c0_14] : memref<8x256xf32, #tpu.memory_space<vmem>>, vector<8x256xf32>
    %cst_15 = arith.constant dense<0.000000e+00> : vector<8x8xf32>
    %32 = tpu.matmul %31, %30, %cst_15 {dimension_numbers = #tpu.dot_dimension_numbers<[1], [1], [0], [0], [0, 0, 1, 0], [], []>} : vector<8x256xf32>, vector<8x256xf32>, vector<8x8xf32> -> vector<8x8xf32>
    %33 = vector.extract_strided_slice %32 {offsets = [0, 0], sizes = [1, 8], strides = [1, 1]} : vector<8x8xf32> to vector<1x8xf32>
    %c0_16 = arith.constant 0 : index
    %c0_17 = arith.constant 0 : index
    %34 = vector.load %arg7[%c0_16, %c0_17] : memref<1x1xf32, #tpu.memory_space<vmem>>, vector<1x1xf32>
    %35 = vector.broadcast %34 : vector<1x1xf32> to vector<1x8xf32>
    %36 = arith.addf %33, %35 : vector<1x8xf32>
    %c0_18 = arith.constant 0 : index
    %c0_19 = arith.constant 0 : index
    %c0_20 = arith.constant 0 : index
    %37 = vector.load %arg8[%c0_18, %c0_19, %c0_20] : memref<1x1x8xf32, #tpu.memory_space<vmem>>, vector<1x1x8xf32>
    %38 = vector.shape_cast %37 : vector<1x1x8xf32> to vector<1x8xf32>
    %39 = vector.shape_cast %36 : vector<1x8xf32> to vector<1x1x8xf32>
    tpu.vector_store %arg8[%c0_18, %c0_19, %c0_20], %39 {strides = array<i32>} : memref<1x1x8xf32, #tpu.memory_space<vmem>>, vector<1x1x8xf32>,
    return
  }
  func.func @transform_0(%arg0: i32) -> (i32, i32) {
    %c0_i32 = arith.constant 0 : i32
    %c0_i32_0 = arith.constant 0 : i32
    return %arg0, %c0_i32 : i32, i32
  }
  func.func @transform_1(%arg0: i32) -> (i32, i32) {
    %c0_i32 = arith.constant 0 : i32
    %c0_i32_0 = arith.constant 0 : i32
    %c0_i32_1 = arith.constant 0 : i32
    return %c0_i32, %c0_i32_0 : i32, i32
  }
  func.func @transform_2(%arg0: i32) -> (i32, i32) {
    %c0_i32 = arith.constant 0 : i32
    %c0_i32_0 = arith.constant 0 : i32
    %c0_i32_1 = arith.constant 0 : i32
    return %c0_i32, %c0_i32_0 : i32, i32
  }
  func.func @transform_3(%arg0: i32) -> (i32, i32) {
    %c0_i32 = arith.constant 0 : i32
    %c0_i32_0 = arith.constant 0 : i32
    %c0_i32_1 = arith.constant 0 : i32
    return %c0_i32, %c0_i32_0 : i32, i32
  }
  func.func @transform_4(%arg0: i32) -> (i32, i32) {
    %c0_i32 = arith.constant 0 : i32
    %c0_i32_0 = arith.constant 0 : i32
    %c0_i32_1 = arith.constant 0 : i32
    return %c0_i32, %c0_i32_0 : i32, i32
  }
  func.func @transform_5(%arg0: i32) -> (i32, i32) {
    %c0_i32 = arith.constant 0 : i32
    %c0_i32_0 = arith.constant 0 : i32
    %c0_i32_1 = arith.constant 0 : i32
    return %c0_i32, %c0_i32_0 : i32, i32
  }
  func.func @transform_6(%arg0: i32) -> (i32, i32) {
    %c0_i32 = arith.constant 0 : i32
    %c0_i32_0 = arith.constant 0 : i32
    %c0_i32_1 = arith.constant 0 : i32
    return %c0_i32, %c0_i32_0 : i32, i32
  }
  func.func @transform_7(%arg0: i32) -> (i32, i32, i32) {
    %c0_i32 = arith.constant 0 : i32
    %c0_i32_0 = arith.constant 0 : i32
    %c0_i32_1 = arith.constant 0 : i32
    return %arg0, %c0_i32, %c0_i32_0 : i32, i32, i32
  }
}

</mosaic_0001>

<bundles_post_ra>
// kernel: tpu_custom_call.1
= control target key start
LH: loop header
LB: loop body
LE: loop exit
PB: predicated region body
PF: predicated region fallthrough
CT: control target
= control target key end

     0   :  { %s802_s0 = inlined_call_operand.vmem [shape: f32[8,3], index: 0, kind: input, shape index: {}]   ;;  %s803_s1 = inlined_call_operand.hbm [shape: f32[3,256], index: 1, kind: input, shape index: {}]   ;;  %s804_s2 = inlined_call_operand.vmem [shape: f32[1,256], index: 2, kind: input, shape index: {}]   ;;  %s805_s3 = inlined_call_operand.hbm [shape: bf16[256,256], index: 3, kind: input, shape index: {}]   ;;  %s806_s4 = inlined_call_operand.hbm [shape: f32[1,256], index: 4, kind: input, shape index: {}]   ;;  %s807_s5 = inlined_call_operand.vmem [shape: f32[8,256], index: 5, kind: input, shape index: {}]   ;;  %s808_s6 = inlined_call_operand.<no memory space> [shape: f32[1,1], index: 6, kind: input, shape index: {}]   ;;  %s809_s7 = inlined_call_operand.hbm [shape: f32[1,1,8], index: 7, kind: output, shape index: {}]  }
   0x1   :  { %v12_v0 = vstv %s808_s6 }
   0x2   :  { %13 = vst [vmem:[#allocation2] sm:$0x1] %v12_v0 }
   0x3   :  { %14 = vsyncpa [#allocation4], 0 }
   0x4   :  { %15 = vsyncpa [#allocation7], 0  ;;  %s36_s28 = sshll.u32 %s805_s3, 4  ;;  %s37_s28 = int_to_ptr.hbm [resolvable:$true] %s36_s28 }
   0x5   :  { %16 = vsyncpa [#allocation5], 0  ;;  %s726_s29 = smov [#allocation6]   ;;  %s24_s10 = sshll.u32 %s803_s1, 4  ;;  %s25_s10 = int_to_ptr.hbm [resolvable:$true] %s24_s10 }
   0x6   :  { %s38_s30 = sshll.u32 %s726_s29, 4  ;;  %s727_s11 = smov 128   ;;  %s39_s30 = int_to_ptr.vmem [resolvable:$true] %s38_s30 }
   0x7   :  { %s728_s12 = smov 8   ;;  %s729_s6 = smov [#allocation3]  }
   0x8   :  { %44 = dma.hbm_to_vmem [thread:$0]  %s37_s28, 4096, %s39_s30, [#allocation7], %s727_s11, %s727_s11, %s728_s12  }
   0x9   :  { %s26_s13 = sshll.u32 %s729_s6, 4  ;;  %s50_s16 = sshll.u32 %s806_s4, 4  ;;  %s27_s13 = int_to_ptr.vmem [resolvable:$true] %s26_s13  ;;  %s51_s16 = int_to_ptr.hbm [resolvable:$true] %s50_s16 }
   0xa   :  { %29 = dma.hbm_to_vmem [thread:$0]  %s25_s10, 128, %s27_s13, [#allocation4]  }
   0xb   :  { %s730_s3 = smov [#allocation8]  }
   0xc   :  { %s52_s17 = sshll.u32 %s730_s3, 4  ;;  %s53_s17 = int_to_ptr.vmem [resolvable:$true] %s52_s17 }
   0xd   :  { %55 = dma.hbm_to_vmem [thread:$0]  %s51_s16, 32, %s53_s17, [#allocation7]  }
   0xe   :  { %720 = dma.done.wait [#allocation4], 128  }
   0xf   :  { %721 = vsyncadd [#allocation4], 4294967168 }
  0x10   :  { %722 = dma.done.wait [#allocation7], 4128  }
  0x11   :  { %723 = vsyncadd [#allocation7], 4294963168  ;;  %v731_v1 = vmov 0   ;;  %v732_v2 = vmov 2   ;;  %v72_v3 = vld [vmem:[%s802_s0] sm:$0xff]  ;;  %v733_v38 = vmov 1  }
  0x12   :  { %619 = vset.pattern.permute.xlu0 %v731_v1  ;;  %621 = vset.pattern.permute.xlu1 %v732_v2  ;;  %v508_v4 = vld [vmem:[#allocation6 + $0x70] sm:$0xf]  ;;  %v593_v5 = vld [vmem:[#allocation6 + $0x74] sm:$0xf0]  ;;  %v592_v9 = vld [vmem:[#allocation6 + $0x74] sm:$0xf] }
  0x13   :  { %77 = vperm.xlu0 %619, %v72_v3   ;;  %112 = vperm.xlu1 %621, %v72_v3   ;;  %v509_v6 = vor.u32 %v593_v5, %v508_v4  ;;  %v572_v7 = vld [vmem:[#allocation6 + $0xf0] sm:$0xf]  ;;  %v609_v8 = vld [vmem:[#allocation6 + $0xf4] sm:$0xf0]  ;;  %v510_v11 = vld [vmem:[#allocation6 + $0x78] sm:$0xf0] }
  0x14   :  { %v573_v10 = vor.u32 %v609_v8, %v572_v7  ;;  %v608_v12 = vld [vmem:[#allocation6 + $0xf4] sm:$0xf]  ;;  %v574_v13 = vld [vmem:[#allocation6 + $0xf8] sm:$0xf0]  ;;  %v513_v14 = vor.u32 %v592_v9, %v510_v11  ;;  %v500_v16 = vld [vmem:[#allocation6 + $0x60] sm:$0xf] }
  0x15   :  { %326 = vmatpush.bf16.msra.mxu0 %v509_v6  ;;  %v577_v15 = vor.u32 %v608_v12, %v574_v13  ;;  %v591_v17 = vld [vmem:[#allocation6 + $0x64] sm:$0xf0]  ;;  %v564_v18 = vld [vmem:[#allocation6 + $0xe0] sm:$0xf]  ;;  %v590_v21 = vld [vmem:[#allocation6 + $0x64] sm:$0xf] }
  0x16   :  { %339 = vmatpush.bf16.msra.mxu1 %v573_v10  ;;  %v501_v19 = vor.u32 %v591_v17, %v500_v16  ;;  %v607_v20 = vld [vmem:[#allocation6 + $0xe4] sm:$0xf0]  ;;  %v502_v22 = vld [vmem:[#allocation6 + $0x68] sm:$0xf0]  ;;  %352 = vmatpush.bf16.msra.mxu2 %v513_v14  ;;  %v606_v25 = vld [vmem:[#allocation6 + $0xe4] sm:$0xf] }
  0x17   :  { %365 = vmatpush.bf16.msra.mxu3 %v577_v15  ;;  %v565_v23 = vor.u32 %v607_v20, %v564_v18  ;;  %v505_v24 = vor.u32 %v590_v21, %v502_v22  ;;  %v566_v26 = vld [vmem:[#allocation6 + $0xe8] sm:$0xf0]  ;;  %v492_v27 = vld [vmem:[#allocation6 + $0x50] sm:$0xf]  ;;  %v589_v29 = vld [vmem:[#allocation6 + $0x54] sm:$0xf0] }
  0x18   :  { %v569_v28 = vor.u32 %v606_v25, %v566_v26  ;;  %v556_v30 = vld [vmem:[#allocation6 + $0xd0] sm:$0xf]  ;;  %v605_v31 = vld [vmem:[#allocation6 + $0xd4] sm:$0xf0]  ;;  %v493_v32 = vor.u32 %v589_v29, %v492_v27  ;;  %v588_v33 = vld [vmem:[#allocation6 + $0x54] sm:$0xf] }
  0x19   :  { %327 = vmatpush.bf16.msra.mxu0 %v501_v19  ;;  %v494_v34 = vld [vmem:[#allocation6 + $0x58] sm:$0xf0]  ;;  %v604_v35 = vld [vmem:[#allocation6 + $0xd4] sm:$0xf]  ;;  %v557_v36 = vor.u32 %v605_v31, %v556_v30  ;;  %v484_v41 = vld [vmem:[#allocation6 + $0x40] sm:$0xf] }
  0x1a   :  { %340 = vmatpush.bf16.msra.mxu1 %v565_v23  ;;  %v558_v37 = vld [vmem:[#allocation6 + $0xd8] sm:$0xf0]  ;;  %353 = vmatpush.bf16.msra.mxu2 %v505_v24  ;;  %v497_v39 = vor.u32 %v588_v33, %v494_v34  ;;  %v587_v42 = vld [vmem:[#allocation6 + $0x44] sm:$0xf0]  ;;  %v548_v43 = vld [vmem:[#allocation6 + $0xc0] sm:$0xf] }
  0x1b   :  { %620 = vset.pattern.permute.xlu0 %v733_v38  ;;  %366 = vmatpush.bf16.msra.mxu3 %v569_v28  ;;  %v561_v40 = vor.u32 %v604_v35, %v558_v37  ;;  %v485_v44 = vor.u32 %v587_v42, %v484_v41  ;;  %v603_v45 = vld [vmem:[#allocation6 + $0xc4] sm:$0xf0]  ;;  %v586_v46 = vld [vmem:[#allocation6 + $0x44] sm:$0xf]  ;;  %v486_v47 = vld [vmem:[#allocation6 + $0x48] sm:$0xf0] }
  0x1c   :  { %97 = vperm.xlu0 %620, %v72_v3   ;;  %622 = vset.pattern.permute.xlu1 %v731_v1  ;;  %v549_v48 = vor.u32 %v603_v45, %v548_v43  ;;  %v489_v49 = vor.u32 %v586_v46, %v486_v47  ;;  %v602_v50 = vld [vmem:[#allocation6 + $0xc4] sm:$0xf]  ;;  %v550_v51 = vld [vmem:[#allocation6 + $0xc8] sm:$0xf0]  ;;  %v476_v53 = vld [vmem:[#allocation6 + $0x30] sm:$0xf] }
  0x1d   :  { %328 = vmatpush.bf16.msra.mxu0 %v493_v32  ;;  %v553_v52 = vor.u32 %v602_v50, %v550_v51  ;;  %v585_v54 = vld [vmem:[#allocation6 + $0x34] sm:$0xf0]  ;;  %v540_v55 = vld [vmem:[#allocation6 + $0xb0] sm:$0xf]  ;;  %v584_v58 = vld [vmem:[#allocation6 + $0x34] sm:$0xf] }
  0x1e   :  { %341 = vmatpush.bf16.msra.mxu1 %v557_v36  ;;  %354 = vmatpush.bf16.msra.mxu2 %v497_v39  ;;  %v477_v56 = vor.u32 %v585_v54, %v476_v53  ;;  %v601_v57 = vld [vmem:[#allocation6 + $0xb4] sm:$0xf0]  ;;  %v478_v59 = vld [vmem:[#allocation6 + $0x38] sm:$0xf0]  ;;  %v600_v62 = vld [vmem:[#allocation6 + $0xb4] sm:$0xf] }
  0x1f   :  { %367 = vmatpush.bf16.msra.mxu3 %v561_v40  ;;  %v541_v60 = vor.u32 %v601_v57, %v540_v55  ;;  %v481_v61 = vor.u32 %v584_v58, %v478_v59  ;;  %v542_v63 = vld [vmem:[#allocation6 + $0xb8] sm:$0xf0]  ;;  %v468_v0 = vld [vmem:[#allocation6 + $0x20] sm:$0xf]  ;;  %v583_v2 = vld [vmem:[#allocation6 + $0x24] sm:$0xf0] }
  0x20   :  { %v532_v3 = vld [vmem:[#allocation6 + $0xa0] sm:$0xf]  ;;  %v599_v4 = vld [vmem:[#allocation6 + $0xa4] sm:$0xf0]  ;;  %v469_v5 = vor.u32 %v583_v2, %v468_v0  ;;  %v582_v7 = vld [vmem:[#allocation6 + $0x24] sm:$0xf] }
  0x21   :  { %329 = vmatpush.bf16.msra.mxu0 %v485_v44  ;;  %v533_v6 = vor.u32 %v599_v4, %v532_v3  ;;  %v470_v8 = vld [vmem:[#allocation6 + $0x28] sm:$0xf0]  ;;  %v598_v9 = vld [vmem:[#allocation6 + $0xa4] sm:$0xf]  ;;  %v460_v13 = vld [vmem:[#allocation6 + $0x10] sm:$0xf] }
  0x22   :  { %342 = vmatpush.bf16.msra.mxu1 %v549_v48  ;;  %355 = vmatpush.bf16.msra.mxu2 %v489_v49  ;;  %v473_v10 = vor.u32 %v582_v7, %v470_v8  ;;  %v534_v11 = vld [vmem:[#allocation6 + $0xa8] sm:$0xf0]  ;;  %v581_v14 = vld [vmem:[#allocation6 + $0x14] sm:$0xf0]  ;;  %v524_v16 = vld [vmem:[#allocation6 + $0x90] sm:$0xf] }
  0x23   :  { %368 = vmatpush.bf16.msra.mxu3 %v553_v52  ;;  %v537_v12 = vor.u32 %v598_v9, %v534_v11  ;;  %v461_v15 = vor.u32 %v581_v14, %v460_v13  ;;  %v597_v17 = vld [vmem:[#allocation6 + $0x94] sm:$0xf0]  ;;  %v580_v18 = vld [vmem:[#allocation6 + $0x14] sm:$0xf]  ;;  %v462_v20 = vld [vmem:[#allocation6 + $0x18] sm:$0xf0] }
  0x24   :  { %623 = vset.pattern.permute.xlu0 %v731_v1  ;;  %v545_v1 = vor.u32 %v600_v62, %v542_v63  ;;  %v525_v19 = vor.u32 %v597_v17, %v524_v16  ;;  %v596_v21 = vld [vmem:[#allocation6 + $0x94] sm:$0xf]  ;;  %v526_v22 = vld [vmem:[#allocation6 + $0x98] sm:$0xf0]  ;;  %v465_v23 = vor.u32 %v580_v18, %v462_v20  ;;  %v452_v25 = vld [vmem:[#allocation6] sm:$0xf] }
  0x25   :  { %330 = vmatpush.bf16.msra.mxu0 %v477_v56  ;;  %v529_v24 = vor.u32 %v596_v21, %v526_v22  ;;  %v579_v26 = vld [vmem:[#allocation6 + $0x4] sm:$0xf0]  ;;  %v516_v27 = vld [vmem:[#allocation6 + $0x80] sm:$0xf]  ;;  %v578_v30 = vld [vmem:[#allocation6 + $0x4] sm:$0xf] }
  0x26   :  { %343 = vmatpush.bf16.msra.mxu1 %v541_v60  ;;  %356 = vmatpush.bf16.msra.mxu2 %v481_v61  ;;  %v453_v28 = vor.u32 %v579_v26, %v452_v25  ;;  %v595_v29 = vld [vmem:[#allocation6 + $0x84] sm:$0xf0]  ;;  %v454_v31 = vld [vmem:[#allocation6 + $0x8] sm:$0xf0]  ;;  %v594_v34 = vld [vmem:[#allocation6 + $0x84] sm:$0xf] }
  0x27   :  { %369 = vmatpush.bf16.msra.mxu3 %v545_v1  ;;  %v517_v32 = vor.u32 %v595_v29, %v516_v27  ;;  %v457_v33 = vor.u32 %v578_v30, %v454_v31  ;;  %v518_v35 = vld [vmem:[#allocation6 + $0x88] sm:$0xf0]  ;;  %v74_v37 = vld [vmem:[#allocation3] ss:$4 sm:$0x3]  ;;  %v381_v21 = vld [vmem:[%s807_s5 + $0x8] sm:$0xff] }
  0x28   :  { %v521_v36 = vor.u32 %v594_v34, %v518_v35  ;;  %v73_v39 = vld [vmem:[%s804_s2] sm:$0x3]  ;;  %v81_v40 = vperm.slane %v74_v37, 0  ;;  %v82_v41 = vperm.slane %v74_v37, 1  ;;  %s734_s22 = smov [#allocation9]   ;;  %s439_s26 = sshll.u32 %s809_s7, 4  ;;  %s440_s26 = int_to_ptr.hbm [resolvable:$true] %s439_s26 }
  0x29   :  { %331 = vmatpush.bf16.msra.mxu0 %v469_v5  ;;  %v110_v42 = vld [vmem:[#allocation3 + $0x2] ss:$4 sm:$0x3]  ;;  %v95_v43 = vld [vmem:[#allocation3 + $0x1] ss:$4 sm:$0x3] }
  0x2a   :  { %344 = vmatpush.bf16.msra.mxu1 %v533_v6  ;;  %357 = vmatpush.bf16.msra.mxu2 %v473_v10  ;;  %v88_v44 = vperm.slane %v73_v39, 0  ;;  %v89_v45 = vperm.slane %v73_v39, 1  ;;  %v116_v46 = vperm.slane %v110_v42, 0  ;;  %v117_v47 = vperm.slane %v110_v42, 1  ;;  %v422_v4 = vld [vmem:[#allocation2] sm:$0x1] }
  0x2b   :  { %370 = vmatpush.bf16.msra.mxu3 %v537_v12  ;;  %v101_v50 = vperm.slane %v95_v43, 0  ;;  %v102_v51 = vperm.slane %v95_v43, 1  ;;  %425 = vperm.xlu1 %622, %v422_v4   ;;  %v160_v5 = vld [vmem:[#allocation8] sm:$0x3]  ;;  %s437_s23 = sshll.u32 %s734_s22, 4  ;;  %vm430_vm0 = vcmask 57344   ;;  %s438_s23 = int_to_ptr.vmem [resolvable:$true] %s437_s23 }
  0x2c   :  { %v162_v6 = vperm.slane %v160_v5, 0  ;;  %v163_v11 = vperm.slane %v160_v5, 1 }
  0x2d   :  { %332 = vmatpush.bf16.msra.mxu0 %v461_v15  ;;  %v380_v15 = vld [vmem:[%s807_s5] sm:$0xff] }
  0x2e   :  { %345 = vmatpush.bf16.msra.mxu1 %v525_v19  ;;  %358 = vmatpush.bf16.msra.mxu2 %v465_v23 }
  0x2f   :  { %371 = vmatpush.bf16.msra.mxu3 %v529_v24 }
  0x31   :  { %333 = vmatpush.bf16.msra.mxu0 %v453_v28 }
  0x32   :  { %346 = vmatpush.bf16.msra.mxu1 %v517_v32  ;;  %359 = vmatpush.bf16.msra.mxu2 %v457_v33 }
  0x33   :  { %372 = vmatpush.bf16.msra.mxu3 %v521_v36 }
  0x85   :  { %v78_v38 = vpop.permute.xlu0 %77  ;;  %v113_v52 = vpop.permute.xlu1 %112 }
  0x86   :  { %v85_v48 = vmul.f32 %v81_v40, %v78_v38  ;;  %v86_v49 = vmul.f32 %v82_v41, %v78_v38  ;;  %v120_v54 = vmul.f32 %v116_v46, %v113_v52  ;;  %v121_v55 = vmul.f32 %v117_v47, %v113_v52 }
  0x88   :  { %v92_v56 = vadd.f32 %v88_v44, %v85_v48  ;;  %v93_v57 = vadd.f32 %v89_v45, %v86_v49 }
  0x8e   :  { %v98_v53 = vpop.permute.xlu0 %97 }
  0x8f   :  { %v105_v58 = vmul.f32 %v101_v50, %v98_v53  ;;  %v106_v59 = vmul.f32 %v102_v51, %v98_v53 }
  0x91   :  { %v107_v60 = vadd.f32 %v105_v58, %v92_v56  ;;  %v108_v61 = vadd.f32 %v106_v59, %v93_v57 }
  0x93   :  { %v122_v62 = vadd.f32 %v120_v54, %v107_v60  ;;  %v123_v63 = vadd.f32 %v121_v55, %v108_v61 }
  0x95   :  { %v124_v0 = vmax.f32 %v122_v62, 0.0  ;;  %v125_v1 = vmax.f32 %v123_v63, 0.0 }
  0x97   :  { %v126_v2 = vpack.c.bf16 %v124_v0, %v124_v0  ;;  %v127_v3 = vpack.c.bf16 %v125_v1, %v125_v1 }
  0x99   :  { %334 = vmatmul.bf16.vlgmr.msra.gmra.mxu0 %v126_v2  ;;  %347 = vmatmul.bf16.vlgmr.msra.gmra.mxu1 %v127_v3 }
  0x9a   :  { %360 = vmatmul.bf16.vlgmr.msra.gmra.mxu2 %v126_v2  ;;  %373 = vmatmul.bf16.vlgmr.msra.gmra.mxu3 %v127_v3 }
  0x9d   :  { %v426_v24 = vpop.permute.xlu1 %425 }
  0x9e   :  { %v428_v26 = vperm.slane %v426_v24, 0 }
 0x116   :  { %v335_v7 = vpop.f32.mrf.mxu0  ;;  %v348_v8 = vpop.f32.mrf.mxu1 }
 0x117   :  { %v336_v9 = vadd.f32 %v335_v7, %v162_v6 }
 0x119   :  { %v349_v10 = vadd.f32 %v348_v8, %v336_v9 }
 0x11b   :  { %v378_v12 = vmax.f32 %v349_v10, 0.0 }
 0x11d   :  { %v361_v13 = vpop.f32.mrf.mxu2  ;;  %v374_v14 = vpop.f32.mrf.mxu3  ;;  %397 = vmatpush.xpose.msrb.mxu0 %v378_v12 }
 0x11e   :  { %v362_v16 = vadd.f32 %v361_v13, %v163_v11  ;;  %v337_v17 = vpop.f32.mrf.mxu0  ;;  %v350_v18 = vpop.f32.mrf.mxu1 }
 0x120   :  { %v375_v19 = vadd.f32 %v374_v14, %v362_v16  ;;  %398 = vmatmul.f32.vlgmr.msrb.gmra.mxu0 %v380_v15 }
 0x122   :  { %v379_v20 = vmax.f32 %v375_v19, 0.0 }
 0x124   :  { %417 = vmatpush.xpose.msrb.mxu1 %v379_v20 }
 0x125   :  { %v363_v22 = vpop.f32.mrf.mxu2  ;;  %v376_v23 = vpop.f32.mrf.mxu3 }
 0x127   :  { %418 = vmatmul.f32.vlgmr.msrb.gmra.mxu1 %v381_v21 }
 0x19d   :  { %v399_v25 = vpop.f32.mrf.mxu0 }
 0x1a4   :  { %v419_v27 = vpop.f32.mrf.mxu1 }
 0x1a5   :  { %v420_v28 = vadd.f32 %v419_v27, %v399_v25 }
 0x1a7   :  { %v429_v29 = vadd.f32 %v428_v26, %v420_v28 }
 0x1a9   :  { %431 = vst.msk [vmem:[#allocation9] sm:$0x1] %vm430_vm0, %v429_v29 }
 0x1aa   :  { %442 = dma.vmem_to_hbm [thread:$0]  %s438_s23, 16, %s440_s26, [#allocation5]  }
 0x1ab   :  { %724 = dma.done.wait [#allocation5], 16  }
 0x1ac   :  { %725 = vsyncadd [#allocation5], 4294967280 }
 0x1ad   :  { %447 = vsyncpa [#allocation4], 1 }
 0x1ae   :  { %448 = vsyncpa [#allocation7], 1 }
 0x1af   :  { %449 = vsyncpa [#allocation5], 1 }

</bundles_post_ra>
